<compile_context>
chip_gen: v5e
topology: v5e:2x2
jax: 0.10.0
libtpu: 0.0.40
codegen_flags: <defaults>
</compile_context>

<pallas_src>
import functools
import math

import jax
import jax.numpy as jnp
from jax.experimental import pallas as pl
from jax.experimental.pallas import tpu as pltpu


_MAX_LANES = 1024                  # cap on the re-chunked row width C (keeps matrices tiny)
_BIG_BLOCK_BYTES = 4 * 1024 * 1024     # v5e / v6e (128 MiB VMEM)
_BIG_VMEM_LIMIT = 80 * 1024 * 1024
_SMALL_BLOCK_BYTES = 2 * 1024 * 1024   # v7x-class (64 MiB VMEM) / unknown chips
_SMALL_VMEM_LIMIT = 48 * 1024 * 1024


def _cdiv(a, b):
    return -(-a // b)


def _round_up(v, m):
    return _cdiv(v, m) * m


@functools.lru_cache(maxsize=None)
def _tpu_config():
    """Returns (block_bytes, vmem_limit_bytes, min_grid, two_tensorcores)."""
    kind = ""
    try:
        kind = jax.devices()[0].device_kind.lower()
    except Exception:
        pass
    two_tc = "v7" in kind
    vmem_cap = None
    try:
        cap = int(getattr(pltpu.get_tpu_info(), "vmem_capacity_bytes", 0) or 0)
        if cap > 0:
            vmem_cap = cap
    except Exception:
        vmem_cap = None
    if vmem_cap is None:
        vmem_cap = 128 * 1024 * 1024 if any(t in kind for t in ("v4", "v5", "v6")) else 64 * 1024 * 1024
    big_vmem = (not two_tc) and vmem_cap >= 100 * 1024 * 1024
    if big_vmem:
        block_bytes, vmem_limit = _BIG_BLOCK_BYTES, _BIG_VMEM_LIMIT
    else:
        block_bytes, vmem_limit = _SMALL_BLOCK_BYTES, _SMALL_VMEM_LIMIT
    min_grid = 8 if two_tc else 4
    return block_bytes, vmem_limit, min_grid, two_tc


def _choose_tm(rows, tm_cap, min_grid, two_tc, q):
    """Row-tile size: VMEM-capped, >=min_grid pipelined steps, even grid on 2-TC chips."""
    if rows < min_grid * q:
        tm = min(rows, tm_cap)                       # tiny input: full-extent block(s)
    else:
        tm = min(tm_cap, max(q, _round_up(_cdiv(rows, min_grid), q)))
    grid_n = _cdiv(rows, tm)
    if two_tc and grid_n > 1 and grid_n % 2 == 1:
        tm_alt = max(q, _round_up(_cdiv(rows, grid_n + 1), q))
        if tm_alt <= tm_cap and _cdiv(rows, tm_alt) % 2 == 0:
            tm = tm_alt
    return tm


def _simnorm_kernel(x_ref, r_ref, b_ref, o_ref):
    x = x_ref[...].astype(jnp.float32)                       # (tm, C), lane-dense
    rowmax = jnp.max(x, axis=-1, keepdims=True)              # (tm, 1): cheap lane reduce
    # Per-row max (instead of per-group): mathematically identical after normalization.
    # The -80 clamp guarantees no group ever fully underflows -> never 0/0 -> never NaN.
    z = jnp.maximum(x - rowmax, -80.0)
    e = jnp.exp(z)                                           # EUP, values in (0, 1]

    # Segmented (per-group) sum on the MXU: hi/lo bf16 split of e gives ~f32 accuracy
    # with exactly 2 bf16 passes per matmul on every TPU generation (no reliance on the
    # compiler's f32-matmul precision policy).
    e_hi = e.astype(jnp.bfloat16)
    e_lo = (e - e_hi.astype(jnp.float32)).astype(jnp.bfloat16)
    r = r_ref[...]                                           # (C, C/d) 0/1 reduce matrix
    gsum = (jnp.dot(e_hi, r, preferred_element_type=jnp.float32)
            + jnp.dot(e_lo, r, preferred_element_type=jnp.float32))      # (tm, C/d)

    inv = pl.reciprocal(gsum, approx=False)                  # exact; small array (C/d lanes)
    inv_hi = inv.astype(jnp.bfloat16)
    inv_lo = (inv - inv_hi.astype(jnp.float32)).astype(jnp.bfloat16)
    b = b_ref[...]                                           # (C/d, C) 0/1 broadcast matrix
    invb = (jnp.dot(inv_hi, b, preferred_element_type=jnp.float32)
            + jnp.dot(inv_lo, b, preferred_element_type=jnp.float32))    # (tm, C)

    o_ref[...] = (e * invb).astype(o_ref.dtype)


def simnorm(x: jax.Array, simnorm_dim: int) -> jax.Array:
    """Simplicial normalization: softmax over groups of `simnorm_dim` along the last axis."""
    d = int(simnorm_dim)
    orig_shape = x.shape
    f = int(orig_shape[-1])
    if f % d != 0:
        raise ValueError("last dim must be divisible by simnorm_dim")

    total = 1
    for s in orig_shape:
        total *= int(s)
    if total == 0:
        return x

    block_bytes, vmem_limit, min_grid, two_tc = _tpu_config()
    itemsize = jnp.dtype(x.dtype).itemsize
    q = max(8, 32 // itemsize)                     # sublane quantum for this dtype

    # ---- lane-dense re-chunking (+ zero padding of whole groups, never lane-sparse) ----
    # Groups are d consecutive elements of the flattened array; any row width C with
    # C % d == 0 keeps every group inside one row and aligned.  C ~ 128*d makes the
    # reduce-matrix output 128 lanes wide (full MXU lane utilization) when possible.
    lane_mult = math.lcm(d, 128)
    c = min(128 * d, _MAX_LANES, _round_up(total, lane_mult))
    c = max(lane_mult, (c // lane_mult) * lane_mult)
    rows = max(q, _cdiv(total, c))                 # at least one full sublane tile of rows
    padded = rows * c

    xflat = x.reshape(-1)
    if padded != total:
        xflat = jnp.pad(xflat, (0, padded - total))    # padded groups are whole & discarded
    x2 = xflat.reshape(rows, c)

    # 0/1 reduce (C, C/d) and broadcast (C/d, C) matrices for the MXU segmented softmax.
    # bf16 holds 0.0 / 1.0 exactly; DMA'd to VMEM once (constant block index below).
    g = c // d
    gid = jnp.arange(c, dtype=jnp.int32) // d
    r_mat = (gid[:, None] == jnp.arange(g, dtype=jnp.int32)[None, :]).astype(jnp.bfloat16)
    b_mat = r_mat.T

    # ---- VMEM-budgeted row tile (HBM block budget in the I/O dtype) ----
    tm_cap = max(q, (block_bytes // (itemsize * c)) // q * q)
    tm = _choose_tm(rows, tm_cap, min_grid, two_tc, q)
    grid = (_cdiv(rows, tm),)

    out2 = pl.pallas_call(
        _simnorm_kernel,
        out_shape=jax.ShapeDtypeStruct((rows, c), x.dtype),
        grid=grid,
        in_specs=[
            pl.BlockSpec((tm, c), lambda i: (i, 0)),
            pl.BlockSpec((c, g), lambda i: (0, 0)),   # constant block -> fetched once
            pl.BlockSpec((g, c), lambda i: (0, 0)),   # constant block -> fetched once
        ],
        out_specs=pl.BlockSpec((tm, c), lambda i: (i, 0)),
        compiler_params=pltpu.CompilerParams(
            dimension_semantics=("parallel",),
            vmem_limit_bytes=vmem_limit,
        ),
    )(x2, r_mat, b_mat)

    outflat = out2.reshape(-1)
    if padded != total:
        outflat = outflat[:total]
    return outflat.reshape(orig_shape)


def _simnorm_ref(x, simnorm_dim):
    shp = x.shape
    grp = x.reshape(*shp[:-1], -1, simnorm_dim).astype(jnp.float32)
    grp = jax.nn.softmax(grp, axis=-1)
    return grp.reshape(shp).astype(x.dtype)


if __name__ == "__main__":
    key = jax.random.PRNGKey(0)
    k1, k2, k3, k4, k5 = jax.random.split(key, 5)

    cases = [
        # (input, simnorm_dim, atol, rtol)
        (jax.random.normal(k1, (2, 32), dtype=jnp.float32), 8, 1e-4, 1e-4),          # batch=2, hidden=32
        (jax.random.normal(k2, (2, 8, 512), dtype=jnp.float32), 8, 1e-4, 1e-4),      # lane-dense multi-row path
        (jax.random.normal(k3, (3, 24), dtype=jnp.float32), 8, 1e-4, 1e-4),          # needs zero padding
        (4.0 * jax.random.normal(k4, (2, 4, 36), dtype=jnp.float32), 6, 1e-4, 1e-4),  # non power-of-two group size
        (jax.random.normal(k5, (4, 64), dtype=jnp.bfloat16), 8, 1e-2, 1e-2),          # bf16 I/O, f32 compute inside
    ]
    for x, d, atol, rtol in cases:
        out = jax.block_until_ready(simnorm(x, d))
        ref = _simnorm_ref(x, d)
        assert out.shape == x.shape and out.dtype == x.dtype, (x.shape, d)
        assert jnp.allclose(out.astype(jnp.float32), ref.astype(jnp.float32),
                            atol=atol, rtol=rtol), (x.shape, d)
    print("KERNEL_OK")
</pallas_src>

<mosaic_0001>
module attributes {stable_mosaic.version = 11 : i64} {
  func.func @_simnorm_kernel(%arg0: i32, %arg1: memref<8x128xf32, #tpu.memory_space<vmem>>, %arg2: memref<128x16xbf16, #tpu.memory_space<vmem>>, %arg3: memref<16x128xbf16, #tpu.memory_space<vmem>>, %arg4: memref<8x128xf32, #tpu.memory_space<vmem>>) attributes {dimension_semantics = [#tpu.dimension_semantics<parallel>], iteration_bounds = array<i64: 1>, scalar_prefetch = 0 : i64, scratch_operands = 0 : i64, tpu.core_type = #tpu.core_type<tc>, window_params = [{transform_indices = @transform_0, window_bounds = array<i64: 8, 128>}, {pipeline_mode = #tpu.pipeline_mode<synchronous>, transform_indices = @transform_1, window_bounds = array<i64: 128, 16>}, {pipeline_mode = #tpu.pipeline_mode<synchronous>, transform_indices = @transform_2, window_bounds = array<i64: 16, 128>}, {transform_indices = @transform_3, window_bounds = array<i64: 8, 128>}]} {
    %c0 = arith.constant 0 : index
    %c0_0 = arith.constant 0 : index
    %0 = vector.load %arg1[%c0, %c0_0] : memref<8x128xf32, #tpu.memory_space<vmem>>, vector<8x128xf32>
    %cst = arith.constant dense<0xFF800000> : vector<8xf32>
    %1 = vector.multi_reduction <maximumf>, %0, %cst [1] : vector<8x128xf32> to vector<8xf32>
    %2 = vector.shape_cast %1 : vector<8xf32> to vector<8x1xf32>
    %3 = vector.broadcast %2 : vector<8x1xf32> to vector<8x128xf32>
    %4 = arith.subf %0, %3 : vector<8x128xf32>
    %cst_1 = arith.constant -8.000000e+01 : f32
    %5 = vector.broadcast %cst_1 : f32 to vector<8x128xf32>
    %6 = arith.maximumf %4, %5 : vector<8x128xf32>
    %7 = math.exp %6 : vector<8x128xf32>
    %8 = arith.truncf %7 : vector<8x128xf32> to vector<8x128xbf16>
    %9 = arith.extf %8 : vector<8x128xbf16> to vector<8x128xf32>
    %10 = arith.subf %7, %9 : vector<8x128xf32>
    %11 = arith.truncf %10 : vector<8x128xf32> to vector<8x128xbf16>
    %c0_2 = arith.constant 0 : index
    %c0_3 = arith.constant 0 : index
    %12 = vector.load %arg2[%c0_2, %c0_3] : memref<128x16xbf16, #tpu.memory_space<vmem>>, vector<128x16xbf16>
    %cst_4 = arith.constant dense<0.000000e+00> : vector<8x16xf32>
    %13 = tpu.matmul %8, %12, %cst_4 {dimension_numbers = #tpu.dot_dimension_numbers<[1], [0], [0], [1], [0, 0, 1, 1], [], []>} : vector<8x128xbf16>, vector<128x16xbf16>, vector<8x16xf32> -> vector<8x16xf32>
    %cst_5 = arith.constant dense<0.000000e+00> : vector<8x16xf32>
    %14 = tpu.matmul %11, %12, %cst_5 {dimension_numbers = #tpu.dot_dimension_numbers<[1], [0], [0], [1], [0, 0, 1, 1], [], []>} : vector<8x128xbf16>, vector<128x16xbf16>, vector<8x16xf32> -> vector<8x16xf32>
    %15 = arith.addf %13, %14 : vector<8x16xf32>
    %16 = tpu.reciprocal %15 : vector<8x16xf32> -> vector<8x16xf32>
    %17 = arith.truncf %16 : vector<8x16xf32> to vector<8x16xbf16>
    %18 = arith.extf %17 : vector<8x16xbf16> to vector<8x16xf32>
    %19 = arith.subf %16, %18 : vector<8x16xf32>
    %20 = arith.truncf %19 : vector<8x16xf32> to vector<8x16xbf16>
    %c0_6 = arith.constant 0 : index
    %c0_7 = arith.constant 0 : index
    %21 = vector.load %arg3[%c0_6, %c0_7] : memref<16x128xbf16, #tpu.memory_space<vmem>>, vector<16x128xbf16>
    %cst_8 = arith.constant dense<0.000000e+00> : vector<8x128xf32>
    %22 = tpu.matmul %17, %21, %cst_8 {dimension_numbers = #tpu.dot_dimension_numbers<[1], [0], [0], [1], [0, 0, 1, 1], [], []>} : vector<8x16xbf16>, vector<16x128xbf16>, vector<8x128xf32> -> vector<8x128xf32>
    %cst_9 = arith.constant dense<0.000000e+00> : vector<8x128xf32>
    %23 = tpu.matmul %20, %21, %cst_9 {dimension_numbers = #tpu.dot_dimension_numbers<[1], [0], [0], [1], [0, 0, 1, 1], [], []>} : vector<8x16xbf16>, vector<16x128xbf16>, vector<8x128xf32> -> vector<8x128xf32>
    %24 = arith.addf %22, %23 : vector<8x128xf32>
    %25 = arith.mulf %7, %24 : vector<8x128xf32>
    %c0_10 = arith.constant 0 : index
    %c0_11 = arith.constant 0 : index
    %26 = vector.load %arg4[%c0_10, %c0_11] : memref<8x128xf32, #tpu.memory_space<vmem>>, vector<8x128xf32>
    tpu.vector_store %arg4[%c0_10, %c0_11], %25 {strides = array<i32>} : memref<8x128xf32, #tpu.memory_space<vmem>>, vector<8x128xf32>,
    return
  }
  func.func @transform_0(%arg0: i32) -> (i32, i32) {
    %c0_i32 = arith.constant 0 : i32
    %c0_i32_0 = arith.constant 0 : i32
    return %arg0, %c0_i32 : i32, i32
  }
  func.func @transform_1(%arg0: i32) -> (i32, i32) {
    %c0_i32 = arith.constant 0 : i32
    %c0_i32_0 = arith.constant 0 : i32
    %c0_i32_1 = arith.constant 0 : i32
    return %c0_i32, %c0_i32_0 : i32, i32
  }
  func.func @transform_2(%arg0: i32) -> (i32, i32) {
    %c0_i32 = arith.constant 0 : i32
    %c0_i32_0 = arith.constant 0 : i32
    %c0_i32_1 = arith.constant 0 : i32
    return %c0_i32, %c0_i32_0 : i32, i32
  }
  func.func @transform_3(%arg0: i32) -> (i32, i32) {
    %c0_i32 = arith.constant 0 : i32
    %c0_i32_0 = arith.constant 0 : i32
    return %arg0, %c0_i32 : i32, i32
  }
}

</mosaic_0001>

<bundles_post_ra>
// kernel: tpu_custom_call.1
= control target key start
LH: loop header
LB: loop body
LE: loop exit
PB: predicated region body
PF: predicated region fallthrough
CT: control target
= control target key end

     0   :  { %s326_s0 = inlined_call_operand.vmem [shape: f32[8,128], index: 0, kind: input, shape index: {}]   ;;  %s327_s1 = inlined_call_operand.vmem [shape: bf16[128,16], index: 1, kind: input, shape index: {}]   ;;  %s328_s2 = inlined_call_operand.vmem [shape: bf16[16,128], index: 2, kind: input, shape index: {}]   ;;  %s329_s3 = inlined_call_operand.hbm [shape: f32[8,128], index: 3, kind: output, shape index: {}]  }
   0x1   :  { %v16_v0 = vld [vmem:[%s326_s0] sm:$0xff]  ;;  %v239_v1 = vld [vmem:[%s327_s1 + $0x38] sm:$0xff] }
   0x2   :  { %17 = vmax.xlane.f32.xlu0 %v16_v0 }
   0x3   :  { %8 = vsyncpa [#allocation3], 0  ;;  %104 = vmatpush.bf16.msra.mxu1 %v239_v1  ;;  %v238_v2 = vld [vmem:[%s327_s1 + $0x30] sm:$0xff]  ;;  %91 = vmatpush.bf16.msra.mxu0 %v239_v1  ;;  %v237_v3 = vld [vmem:[%s327_s1 + $0x28] sm:$0xff]  ;;  %vm143_vm4 = vcmask 130048   ;;  %s185_s6 = sshll.u32 %s329_s3, 4  ;;  %s186_s6 = int_to_ptr.hbm [resolvable:$true] %s185_s6 }
   0x4   :  { %v236_v4 = vld [vmem:[%s327_s1 + $0x20] sm:$0xff]  ;;  %v235_v5 = vld [vmem:[%s327_s1 + $0x18] sm:$0xff]  ;;  %v234_v6 = vld [vmem:[%s327_s1 + $0x10] sm:$0xff] }
   0x5   :  { %v233_v7 = vld [vmem:[%s327_s1 + $0x8] sm:$0xff]  ;;  %v232_v8 = vld [vmem:[%s327_s1] sm:$0xff]  ;;  %s272_s1 = smov [#allocation2]  }
   0x6   :  { %v240_v18 = vld [vmem:[%s328_s2] sm:$0xff]  ;;  %s183_s2 = sshll.u32 %s272_s1, 4  ;;  %s184_s2 = int_to_ptr.vmem [resolvable:$true] %s183_s2 }
   0x7   :  { %105 = vmatpush.bf16.msra.mxu1 %v238_v2  ;;  %92 = vmatpush.bf16.msra.mxu0 %v238_v2 }
   0x8   :  { %170 = vmatpush.bf16.msra.mxu3 %v240_v18  ;;  %154 = vmatpush.bf16.msra.mxu2 %v240_v18 }
   0xb   :  { %106 = vmatpush.bf16.msra.mxu1 %v237_v3  ;;  %93 = vmatpush.bf16.msra.mxu0 %v237_v3 }
   0xf   :  { %107 = vmatpush.bf16.msra.mxu1 %v236_v4  ;;  %94 = vmatpush.bf16.msra.mxu0 %v236_v4 }
  0x13   :  { %108 = vmatpush.bf16.msra.mxu1 %v235_v5  ;;  %95 = vmatpush.bf16.msra.mxu0 %v235_v5 }
  0x17   :  { %109 = vmatpush.bf16.msra.mxu1 %v234_v6  ;;  %96 = vmatpush.bf16.msra.mxu0 %v234_v6 }
  0x1b   :  { %110 = vmatpush.bf16.msra.mxu1 %v233_v7  ;;  %97 = vmatpush.bf16.msra.mxu0 %v233_v7 }
  0x1f   :  { %111 = vmatpush.bf16.msra.mxu1 %v232_v8  ;;  %98 = vmatpush.bf16.msra.mxu0 %v232_v8 }
  0x75   :  { %v18_v9 = vpop.xlane.xlu0 %17 }
  0x76   :  { %v19_v10 = vsub.f32 %v16_v0, %v18_v9 }
  0x78   :  { %v20_v11 = vmax.f32 %v19_v10, -80.0 }
  0x7a   :  { %v21_v12 = vmul.f32 1.442695, %v20_v11 }
  0x7c   :  { %242 = vpow2.f32 %v21_v12 }
  0x82   :  { %v243_v13 = vpop.eup %242 }
  0x83   :  { %v23_v14 = vpack.c.bf16 %v243_v13, %v243_v13 }
  0x85   :  { %v24_v15 = vunpack.c.l.bf16 %v23_v14  ;;  %112 = vmatmul.bf16.vlgmr.msra.gmra.mxu1 %v23_v14 }
  0x87   :  { %v25_v16 = vsub.f32 %v243_v13, %v24_v15 }
  0x89   :  { %v26_v17 = vpack.c.bf16 %v25_v16, %v25_v16 }
  0x8b   :  { %99 = vmatmul.bf16.vlgmr.msra.gmra.mxu0 %v26_v17 }
 0x102   :  { %v113_v19 = vpop.f32.mrf.mxu1 }
 0x108   :  { %v100_v20 = vpop.f32.mrf.mxu0 }
 0x109   :  { %v114_v21 = vadd.f32 %v113_v19, %v100_v20 }
 0x10a   :  { %v115_v22 = vpop.f32.mrf.mxu1 }
 0x10b   :  { %244 = vrcp.f32 %v114_v21  ;;  %v128_v27 = vand.u32 2147483648, %v114_v21  ;;  %v126_v29 = vand.u32 2147483647, %v114_v21  ;;  %vm122_vm1 = vweird.f32 %v114_v21 }
 0x10d   :  { %v129_v31 = vor.u32 1.1754944e-38, %v128_v27  ;;  %vm127_vm3 = vcmp.eq.f32.partialorder %v126_v29, 8.507059e+37 }
 0x110   :  { %v102_v23 = vpop.f32.mrf.mxu0 }
 0x111   :  { %v245_v24 = vpop.eup %244 }
 0x112   :  { %v118_v25 = vmul.f32 %v245_v24, %v114_v21  ;;  %vm123_vm0 = vweird.f32 %v245_v24 }
 0x113   :  { %vm124_vm2 = vmor %vm122_vm1, %vm123_vm0 }
 0x114   :  { %v119_v26 = vsub.f32 1.0, %v118_v25 }
 0x116   :  { %v120_v28 = vmul.f32 %v245_v24, %v119_v26 }
 0x118   :  { %v121_v30 = vadd.f32 %v245_v24, %v120_v28 }
 0x11a   :  { %v125_v32 = vsel %vm124_vm2, %v245_v24, %v121_v30 }
 0x11b   :  { %v130_v33 = vsel %vm127_vm3, %v129_v31, %v125_v32 }
 0x11c   :  { %v131_v34 = vpack.c.bf16 %v130_v33, %v130_v33 }
 0x11e   :  { %v132_v35 = vunpack.c.l.bf16 %v131_v34  ;;  %231 = vmatmul.msk.bf16.vlgmr.msra.gmra.mxu3 %vm143_vm4, %v131_v34 }
 0x120   :  { %v133_v36 = vsub.f32 %v130_v33, %v132_v35 }
 0x122   :  { %v134_v37 = vpack.c.bf16 %v133_v36, %v133_v36 }
 0x124   :  { %230 = vmatmul.msk.bf16.vlgmr.msra.gmra.mxu2 %vm143_vm4, %v134_v37 }
 0x1a1   :  { %v172_v38 = vpop.f32.mrf.mxu3 }
 0x1a7   :  { %v156_v39 = vpop.f32.mrf.mxu2 }
 0x1a8   :  { %v173_v40 = vadd.f32 %v172_v38, %v156_v39 }
 0x1a9   :  { %v174_v41 = vpop.f32.mrf.mxu3 }
 0x1aa   :  { %v176_v42 = vmul.f32 %v243_v13, %v173_v40 }
 0x1ac   :  { %177 = vst [vmem:[#allocation2] sm:$0xff] %v176_v42 }
 0x1ad   :  { %188 = dma.vmem_to_hbm [thread:$0]  %s184_s2, 128, %s186_s6, [#allocation3]  }
 0x1af   :  { %v158_v43 = vpop.f32.mrf.mxu2 }
 0x1b0   :  { %270 = dma.done.wait [#allocation3], 128  }
 0x1b1   :  { %271 = vsyncadd [#allocation3], 4294967168 }
 0x1b2   :  { %193 = vsyncpa [#allocation3], 1 }

</bundles_post_ra>
